<compile_context>
chip_gen: v5e
topology: v5e:2x2
jax: 0.10.0
libtpu: 0.0.40
codegen_flags: <defaults>
</compile_context>

<pallas_src>
import jax
import jax.numpy as jnp
from jax import lax
from jax.experimental import pallas as pl
from jax.experimental.pallas import tpu as pltpu


def _cosine_kernel_f32(x1_ref, x2t_ref, inv_n1_ref, inv_n2_ref, o_ref):
    """f32 output: accumulate the partial matmul directly into o_ref (no scratch)."""
    k = pl.program_id(2)

    @pl.when(k == 0)
    def _():
        o_ref[...] = jnp.zeros_like(o_ref)

    # Standard (m,k) x (k,n) contraction -> MXU, f32 accumulation.
    o_ref[...] += lax.dot_general(
        x1_ref[...],
        x2t_ref[...],
        dimension_numbers=(((1,), (0,)), ((), ())),
        preferred_element_type=jnp.float32,
    )

    @pl.when(k == pl.num_programs(2) - 1)
    def _():
        o_ref[...] *= inv_n1_ref[...] * inv_n2_ref[...]  # (tm,1)*(1,tn) -> (tm,tn)


def _cosine_kernel_acc(x1_ref, x2t_ref, inv_n1_ref, inv_n2_ref, o_ref, acc_ref):
    """Lower-precision output: accumulate in f32 scratch, scale + cast at the end."""
    k = pl.program_id(2)

    @pl.when(k == 0)
    def _():
        acc_ref[...] = jnp.zeros_like(acc_ref)

    acc_ref[...] += lax.dot_general(
        x1_ref[...],
        x2t_ref[...],
        dimension_numbers=(((1,), (0,)), ((), ())),
        preferred_element_type=jnp.float32,
    )

    @pl.when(k == pl.num_programs(2) - 1)
    def _():
        scale = inv_n1_ref[...] * inv_n2_ref[...]
        o_ref[...] = (acc_ref[...] * scale).astype(o_ref.dtype)


def _round_up(x, m):
    return ((x + m - 1) // m) * m


def cosine_similarity(x1, x2, *, tm=None, tn=None, tk=None):
    M, D = x1.shape
    N, D2 = x2.shape
    assert D == D2, "feature dims must match"

    out_dtype = jnp.result_type(x1.dtype, x2.dtype)
    in1_b = jnp.dtype(x1.dtype).itemsize
    in2_b = jnp.dtype(x2.dtype).itemsize
    out_b = jnp.dtype(out_dtype).itemsize
    need_acc = out_dtype != jnp.float32

    # Sublane packing for the row (M) tile dim: 8 (f32), 16 (bf16), 32 (int8/fp8).
    m_pack = max(8, 32 // in1_b)

    # dtype-aware tile defaults (bigger tiles for narrower dtypes).
    if tm is None:
        tm = 512 if in1_b >= 4 else 1024
    if tn is None:
        tn = 512 if max(in1_b, in2_b) >= 4 else 1024
    if tk is None:
        tk = 512

    tm = _round_up(tm, m_pack)
    tn = _round_up(tn, 128)
    tk = _round_up(tk, 128)

    # Clamp MN tiles to the (aligned) problem size.
    tm = min(tm, _round_up(M, m_pack))
    tn = min(tn, _round_up(N, 128))

    # Pick tk: use a single K step when D is small, otherwise prefer a tile that
    # divides round_up(D, 128) so the K axis has no zero-padded waste.
    d128 = _round_up(D, 128)
    if d128 <= tk:
        tk = d128
    else:
        for cand in range(tk, 127, -128):
            if d128 % cand == 0:
                tk = cand
                break

    # Megacore (v7x): keep at least 2 MN tiles for medium/large shapes so both
    # TensorCores get work under the ("parallel","parallel",...) semantics.
    if (-(-M // tm)) * (-(-N // tn)) == 1 and max(M, N) >= 256:
        if M >= N:
            tm = _round_up(-(-M // 2), m_pack)
        else:
            tn = _round_up(-(-N // 2), 128)

    # VMEM budget: double-buffered inputs + double-buffered output (+ acc scratch
    # for non-f32 outputs) + tiny inv-norm tiles.  Conservative for v7x (64 MiB).
    def _vmem_est(tm_, tn_, tk_):
        b = 2 * tm_ * tk_ * in1_b + 2 * tk_ * tn_ * in2_b
        b += 2 * tm_ * tn_ * out_b
        if need_acc:
            b += tm_ * tn_ * 4
        b += 2 * (tm_ + tn_) * 4
        return b

    budget = 40 << 20
    while _vmem_est(tm, tn, tk) > budget and tk > 128:
        tk = max(128, (tk // 2 // 128) * 128)
    while _vmem_est(tm, tn, tk) > budget and max(tm, tn) > 256:
        if tm >= tn and tm > 256:
            tm = max(256, _round_up(tm // 2, m_pack))
        else:
            tn = max(256, _round_up(tn // 2, 128))

    Mp, Np, Dp = _round_up(M, tm), _round_up(N, tn), _round_up(D, tk)

    x1_p = x1 if (Mp, Dp) == (M, D) else jnp.pad(x1, ((0, Mp - M), (0, Dp - D)))
    # One-time wrapper transpose of x2 -> (D, N): the kernel then feeds the MXU a
    # standard (k, n) RHS tile with no per-step transpose.
    x2_t = x2.T
    x2t_p = x2_t if (Dp, Np) == (D, N) else jnp.pad(x2_t, ((0, Dp - D), (0, Np - N)))

    f32 = jnp.float32
    # Inverse L2 row norms, computed once from the padded operands (XLA fuses the
    # pad with the reduction).  No epsilon, matching the module: all-zero rows
    # give inf -> NaN.  Padded rows/cols also yield inf, but only in the region
    # that is sliced away below.
    inv_n1 = 1.0 / jnp.sqrt(jnp.sum(x1_p.astype(f32) ** 2, axis=1, keepdims=True))   # (Mp, 1)
    inv_n2 = 1.0 / jnp.sqrt(jnp.sum(x2t_p.astype(f32) ** 2, axis=0, keepdims=True))  # (1, Np)

    grid = (Mp // tm, Np // tn, Dp // tk)

    kernel = _cosine_kernel_acc if need_acc else _cosine_kernel_f32
    scratch_shapes = [pltpu.VMEM((tm, tn), jnp.float32)] if need_acc else []

    vmem_limit = int(min(max(int(_vmem_est(tm, tn, tk) * 1.5), 32 << 20), 48 << 20))

    out_p = pl.pallas_call(
        kernel,
        out_shape=jax.ShapeDtypeStruct((Mp, Np), out_dtype),
        grid_spec=pltpu.PrefetchScalarGridSpec(
            num_scalar_prefetch=0,
            grid=grid,
            in_specs=[
                pl.BlockSpec((tm, tk), lambda i, j, k: (i, k)),   # x1 tile
                pl.BlockSpec((tk, tn), lambda i, j, k: (k, j)),   # x2^T tile
                pl.BlockSpec((tm, 1), lambda i, j, k: (i, 0)),    # 1/||x1 rows||
                pl.BlockSpec((1, tn), lambda i, j, k: (0, j)),    # 1/||x2 rows||
            ],
            out_specs=pl.BlockSpec((tm, tn), lambda i, j, k: (i, j)),
            scratch_shapes=scratch_shapes,
        ),
        compiler_params=pltpu.CompilerParams(
            dimension_semantics=("parallel", "parallel", "arbitrary"),
            vmem_limit_bytes=vmem_limit,
        ),
        cost_estimate=pl.CostEstimate(
            flops=2 * M * N * D,
            transcendentals=0,
            bytes_accessed=(
                Mp * Dp * in1_b * grid[1]      # x1 re-read once per N tile
                + Np * Dp * in2_b * grid[0]    # x2 re-read once per M tile
                + Mp * Np * out_b
            ),
        ),
    )(x1_p, x2t_p, inv_n1, inv_n2)

    return out_p[:M, :N]


def _reference(x1, x2):
    x1 = x1.astype(jnp.float32)
    x2 = x2.astype(jnp.float32)
    n1 = jnp.linalg.norm(x1, axis=1, keepdims=True)
    n2 = jnp.linalg.norm(x2, axis=1, keepdims=True).T
    return (x1 @ x2.T) / (n1 * n2)


if __name__ == "__main__":
    key = jax.random.PRNGKey(0)
    k1, k2, k3, k4, k5, k6 = jax.random.split(key, 6)

    # Small shapes consistent with the module's 2-D .mm() forward.
    M, N, D = 16, 32, 64
    x1 = jax.random.normal(k1, (M, D), dtype=jnp.float32)
    x2 = jax.random.normal(k2, (N, D), dtype=jnp.float32)

    out = jax.block_until_ready(cosine_similarity(x1, x2))
    ref = _reference(x1, x2)
    assert out.shape == (M, N)
    assert jnp.allclose(out, ref, atol=1e-5, rtol=1e-5)

    # Ragged, multi-tile case (exercises the 3-D grid, padding, K-accumulation
    # and the >=2-MN-tile megacore split).
    M2, N2, D2 = 300, 200, 768
    y1 = jax.random.normal(k3, (M2, D2), dtype=jnp.float32)
    y2 = jax.random.normal(k4, (N2, D2), dtype=jnp.float32)

    out2 = jax.block_until_ready(cosine_similarity(y1, y2))
    ref2 = _reference(y1, y2)
    assert out2.shape == (M2, N2)
    assert jnp.allclose(out2, ref2, atol=2e-5, rtol=2e-5)

    # bf16 path (exercises the f32-scratch kernel variant and bf16 tile packing).
    M3, N3, D3 = 64, 256, 256
    z1 = jax.random.normal(k5, (M3, D3), dtype=jnp.bfloat16)
    z2 = jax.random.normal(k6, (N3, D3), dtype=jnp.bfloat16)

    out3 = jax.block_until_ready(cosine_similarity(z1, z2))
    ref3 = _reference(z1, z2)
    assert out3.shape == (M3, N3)
    assert jnp.allclose(out3.astype(jnp.float32), ref3, atol=2e-2, rtol=2e-2)

    print("KERNEL_OK")
</pallas_src>

<mosaic_0001>
module attributes {stable_mosaic.version = 11 : i64} {
  func.func @_cosine_kernel_f32(%arg0: i32, %arg1: i32, %arg2: i32, %arg3: memref<16x128xf32, #tpu.memory_space<vmem>>, %arg4: memref<128x128xf32, #tpu.memory_space<vmem>>, %arg5: memref<16x1xf32, #tpu.memory_space<vmem>>, %arg6: memref<1x128xf32, #tpu.memory_space<vmem>>, %arg7: memref<16x128xf32, #tpu.memory_space<vmem>>) attributes {dimension_semantics = [#tpu.dimension_semantics<parallel>, #tpu.dimension_semantics<parallel>, #tpu.dimension_semantics<arbitrary>], iteration_bounds = array<i64: 1, 1, 1>, scalar_prefetch = 0 : i64, scratch_operands = 0 : i64, tpu.core_type = #tpu.core_type<tc>, window_params = [{transform_indices = @transform_0, window_bounds = array<i64: 16, 128>}, {transform_indices = @transform_1, window_bounds = array<i64: 128, 128>}, {transform_indices = @transform_2, window_bounds = array<i64: 16, 1>}, {transform_indices = @transform_3, window_bounds = array<i64: 1, 128>}, {transform_indices = @transform_4, window_bounds = array<i64: 16, 128>}]} {
    %c0_i32 = arith.constant 0 : i32
    %0 = arith.cmpi eq, %arg2, %c0_i32 : i32
    %1 = arith.extui %0 : i1 to i32
    %c0_i32_0 = arith.constant 0 : i32
    %2 = arith.cmpi ne, %1, %c0_i32_0 : i32
    scf.if %2 {
      %cst_10 = arith.constant 0.000000e+00 : f32
      %12 = vector.broadcast %cst_10 : f32 to vector<16x128xf32>
      %c0_11 = arith.constant 0 : index
      %c0_12 = arith.constant 0 : index
      %13 = vector.load %arg7[%c0_11, %c0_12] : memref<16x128xf32, #tpu.memory_space<vmem>>, vector<16x128xf32>
      tpu.vector_store %arg7[%c0_11, %c0_12], %12 {strides = array<i32>} : memref<16x128xf32, #tpu.memory_space<vmem>>, vector<16x128xf32>,
    } else {
    }
    %c0 = arith.constant 0 : index
    %c0_1 = arith.constant 0 : index
    %3 = vector.load %arg7[%c0, %c0_1] : memref<16x128xf32, #tpu.memory_space<vmem>>, vector<16x128xf32>
    %c0_2 = arith.constant 0 : index
    %c0_3 = arith.constant 0 : index
    %4 = vector.load %arg3[%c0_2, %c0_3] : memref<16x128xf32, #tpu.memory_space<vmem>>, vector<16x128xf32>
    %c0_4 = arith.constant 0 : index
    %c0_5 = arith.constant 0 : index
    %5 = vector.load %arg4[%c0_4, %c0_5] : memref<128x128xf32, #tpu.memory_space<vmem>>, vector<128x128xf32>
    %cst = arith.constant dense<0.000000e+00> : vector<16x128xf32>
    %6 = tpu.matmul %4, %5, %cst {dimension_numbers = #tpu.dot_dimension_numbers<[1], [0], [0], [1], [0, 0, 1, 1], [], []>} : vector<16x128xf32>, vector<128x128xf32>, vector<16x128xf32> -> vector<16x128xf32>
    %7 = arith.addf %3, %6 : vector<16x128xf32>
    %c0_6 = arith.constant 0 : index
    %c0_7 = arith.constant 0 : index
    %8 = vector.load %arg7[%c0_6, %c0_7] : memref<16x128xf32, #tpu.memory_space<vmem>>, vector<16x128xf32>
    tpu.vector_store %arg7[%c0_6, %c0_7], %7 {strides = array<i32>} : memref<16x128xf32, #tpu.memory_space<vmem>>, vector<16x128xf32>,
    %c0_i32_8 = arith.constant 0 : i32
    %9 = arith.cmpi eq, %arg2, %c0_i32_8 : i32
    %10 = arith.extui %9 : i1 to i32
    %c0_i32_9 = arith.constant 0 : i32
    %11 = arith.cmpi ne, %10, %c0_i32_9 : i32
    scf.if %11 {
      %c0_10 = arith.constant 0 : index
      %c0_11 = arith.constant 0 : index
      %12 = vector.load %arg7[%c0_10, %c0_11] : memref<16x128xf32, #tpu.memory_space<vmem>>, vector<16x128xf32>
      %c0_12 = arith.constant 0 : index
      %c0_13 = arith.constant 0 : index
      %13 = vector.load %arg5[%c0_12, %c0_13] : memref<16x1xf32, #tpu.memory_space<vmem>>, vector<16x1xf32>
      %c0_14 = arith.constant 0 : index
      %c0_15 = arith.constant 0 : index
      %14 = vector.load %arg6[%c0_14, %c0_15] : memref<1x128xf32, #tpu.memory_space<vmem>>, vector<1x128xf32>
      %15 = vector.broadcast %13 : vector<16x1xf32> to vector<16x128xf32>
      %16 = vector.broadcast %14 : vector<1x128xf32> to vector<16x128xf32>
      %17 = arith.mulf %15, %16 : vector<16x128xf32>
      %18 = arith.mulf %12, %17 : vector<16x128xf32>
      %c0_16 = arith.constant 0 : index
      %c0_17 = arith.constant 0 : index
      %19 = vector.load %arg7[%c0_16, %c0_17] : memref<16x128xf32, #tpu.memory_space<vmem>>, vector<16x128xf32>
      tpu.vector_store %arg7[%c0_16, %c0_17], %18 {strides = array<i32>} : memref<16x128xf32, #tpu.memory_space<vmem>>, vector<16x128xf32>,
    } else {
    }
    return
  }
  func.func @transform_0(%arg0: i32, %arg1: i32, %arg2: i32) -> (i32, i32) {
    %c0_i32 = arith.constant 0 : i32
    return %arg0, %arg2 : i32, i32
  }
  func.func @transform_1(%arg0: i32, %arg1: i32, %arg2: i32) -> (i32, i32) {
    %c0_i32 = arith.constant 0 : i32
    return %arg2, %arg1 : i32, i32
  }
  func.func @transform_2(%arg0: i32, %arg1: i32, %arg2: i32) -> (i32, i32) {
    %c0_i32 = arith.constant 0 : i32
    %c0_i32_0 = arith.constant 0 : i32
    return %arg0, %c0_i32 : i32, i32
  }
  func.func @transform_3(%arg0: i32, %arg1: i32, %arg2: i32) -> (i32, i32) {
    %c0_i32 = arith.constant 0 : i32
    %c0_i32_0 = arith.constant 0 : i32
    return %c0_i32, %arg1 : i32, i32
  }
  func.func @transform_4(%arg0: i32, %arg1: i32, %arg2: i32) -> (i32, i32) {
    %c0_i32 = arith.constant 0 : i32
    return %arg0, %arg1 : i32, i32
  }
}

</mosaic_0001>

<bundles_post_ra>
// kernel: tpu_custom_call.1
= control target key start
LH: loop header
LB: loop body
LE: loop exit
PB: predicated region body
PF: predicated region fallthrough
CT: control target
= control target key end

     0   :  { %9 = vsyncpa [#allocation3], 0  ;;  %s266_s0 = inlined_call_operand.vmem [shape: f32[16,128], index: 0, kind: input, shape index: {}]   ;;  %s267_s1 = inlined_call_operand.hbm [shape: f32[128,128], index: 1, kind: input, shape index: {}]   ;;  %s268_s2 = inlined_call_operand.vmem [shape: f32[16,1], index: 2, kind: input, shape index: {}]   ;;  %s269_s3 = inlined_call_operand.vmem [shape: f32[1,128], index: 3, kind: input, shape index: {}]   ;;  %s270_s4 = inlined_call_operand.hbm [shape: f32[16,128], index: 4, kind: output, shape index: {}]  }
   0x1   :  { %10 = vsyncpa [#allocation4], 0  ;;  %s17_s17 = sshll.u32 %s267_s1, 4  ;;  %s209_s18 = smov [#allocation2]   ;;  %s18_s17 = int_to_ptr.hbm [resolvable:$true] %s17_s17 }
   0x2   :  { %s19_s19 = sshll.u32 %s209_s18, 4  ;;  %s210_s20 = smov 128   ;;  %s20_s19 = int_to_ptr.vmem [resolvable:$true] %s19_s19 }
   0x3   :  { %s211_s21 = smov 8  }
   0x4   :  { %25 = dma.hbm_to_vmem [thread:$0]  %s18_s17, 2048, %s20_s19, [#allocation3], %s210_s20, %s210_s20, %s211_s21  }
   0x5   :  { %205 = dma.done.wait [#allocation3], 2048  }
   0x6   :  { %206 = vsyncadd [#allocation3], 4294965248  ;;  %v212_v0 = vmov 0   ;;  %v59_v1 = vld [vmem:[#allocation2 + $0x78] sm:$0xff]  ;;  %v58_v2 = vld [vmem:[#allocation2 + $0x70] sm:$0xff]  ;;  %s213_s30 = smov [#allocation5]  }
   0x7   :  { %155 = vset.pattern.permute.xlu0 %v212_v0  ;;  %60 = vmatpush.msra.mxu0 %v59_v1  ;;  %v57_v3 = vld [vmem:[#allocation2 + $0x68] sm:$0xff]  ;;  %v56_v4 = vld [vmem:[#allocation2 + $0x60] sm:$0xff]  ;;  %v55_v5 = vld [vmem:[#allocation2 + $0x58] sm:$0xff]  ;;  %s118_s5 = sshll.u32 %s213_s30, 4  ;;  %s119_s5 = int_to_ptr.vmem [resolvable:$true] %s118_s5 }
   0x8   :  { %133 = vmatpush.msra.mxu1 %v59_v1  ;;  %v92_v6 = vld [vmem:[%s268_s2] sm:$0xff]  ;;  %v54_v7 = vld [vmem:[#allocation2 + $0x50] sm:$0xff]  ;;  %v53_v8 = vld [vmem:[#allocation2 + $0x48] sm:$0xff] }
   0x9   :  { %61 = vmatpush.msra.mxu0 %v58_v2  ;;  %97 = vperm.xlu0 %155, %v92_v6   ;;  %v52_v9 = vld [vmem:[#allocation2 + $0x40] sm:$0xff]  ;;  %v93_v10 = vld [vmem:[%s268_s2 + $0x8] sm:$0xff]  ;;  %v51_v11 = vld [vmem:[#allocation2 + $0x38] sm:$0xff] }
   0xa   :  { %134 = vmatpush.msra.mxu1 %v58_v2  ;;  %v50_v12 = vld [vmem:[#allocation2 + $0x30] sm:$0xff]  ;;  %v49_v13 = vld [vmem:[#allocation2 + $0x28] sm:$0xff]  ;;  %v48_v14 = vld [vmem:[#allocation2 + $0x20] sm:$0xff] }
   0xb   :  { %62 = vmatpush.msra.mxu0 %v57_v3  ;;  %v47_v15 = vld [vmem:[#allocation2 + $0x18] sm:$0xff]  ;;  %v46_v16 = vld [vmem:[#allocation2 + $0x10] sm:$0xff]  ;;  %v45_v17 = vld [vmem:[#allocation2 + $0x8] sm:$0xff] }
   0xc   :  { %135 = vmatpush.msra.mxu1 %v57_v3  ;;  %v44_v18 = vld [vmem:[#allocation2] sm:$0xff]  ;;  %v43_v20 = vld [vmem:[%s266_s0 + $0x8] sm:$0xff] }
   0xd   :  { %63 = vmatpush.msra.mxu0 %v56_v4  ;;  %v42_v19 = vld [vmem:[%s266_s0] sm:$0xff]  ;;  %s120_s0 = sshll.u32 %s270_s4, 4  ;;  %s121_s0 = int_to_ptr.hbm [resolvable:$true] %s120_s0 }
   0xe   :  { %136 = vmatpush.msra.mxu1 %v56_v4  ;;  %v156_v22 = vld [vmem:[%s269_s3] ss:$0 sm:$0xff] }
   0xf   :  { %64 = vmatpush.msra.mxu0 %v55_v5 }
  0x10   :  { %137 = vmatpush.msra.mxu1 %v55_v5 }
  0x11   :  { %65 = vmatpush.msra.mxu0 %v54_v7  ;;  %102 = vperm.xlu0 %155, %v93_v10  }
  0x12   :  { %138 = vmatpush.msra.mxu1 %v54_v7 }
  0x13   :  { %66 = vmatpush.msra.mxu0 %v53_v8 }
  0x14   :  { %139 = vmatpush.msra.mxu1 %v53_v8 }
  0x15   :  { %67 = vmatpush.msra.mxu0 %v52_v9 }
  0x16   :  { %140 = vmatpush.msra.mxu1 %v52_v9 }
  0x17   :  { %68 = vmatpush.msra.mxu0 %v51_v11 }
  0x18   :  { %141 = vmatpush.msra.mxu1 %v51_v11 }
  0x19   :  { %69 = vmatpush.msra.mxu0 %v50_v12 }
  0x1a   :  { %142 = vmatpush.msra.mxu1 %v50_v12 }
  0x1b   :  { %70 = vmatpush.msra.mxu0 %v49_v13 }
  0x1c   :  { %143 = vmatpush.msra.mxu1 %v49_v13 }
  0x1d   :  { %71 = vmatpush.msra.mxu0 %v48_v14 }
  0x1e   :  { %144 = vmatpush.msra.mxu1 %v48_v14 }
  0x1f   :  { %72 = vmatpush.msra.mxu0 %v47_v15 }
  0x20   :  { %145 = vmatpush.msra.mxu1 %v47_v15 }
  0x21   :  { %73 = vmatpush.msra.mxu0 %v46_v16 }
  0x22   :  { %146 = vmatpush.msra.mxu1 %v46_v16 }
  0x23   :  { %74 = vmatpush.msra.mxu0 %v45_v17 }
  0x24   :  { %147 = vmatpush.msra.mxu1 %v45_v17 }
  0x25   :  { %75 = vmatpush.msra.mxu0 %v44_v18 }
  0x26   :  { %148 = vmatpush.msra.mxu1 %v44_v18  ;;  %76 = vmatmul.f32.vlgmr.msra.gmra.mxu0 %v42_v19 }
  0x27   :  { %79 = vmatmul.f32.vlgmr.msra.gmra.mxu1 %v43_v20 }
  0x7b   :  { %v98_v21 = vpop.permute.xlu0 %97 }
  0x7c   :  { %v108_v26 = vmul.f32 %v156_v22, %v98_v21 }
  0x83   :  { %v103_v23 = vpop.permute.xlu0 %102 }
  0x84   :  { %v109_v27 = vmul.f32 %v156_v22, %v103_v23 }
  0xa3   :  { %v77_v24 = vpop.f32.mrf.mxu0 }
  0xa4   :  { %v80_v25 = vpop.f32.mrf.mxu1  ;;  %v110_v28 = vmul.f32 %v108_v26, %v77_v24 }
  0xa5   :  { %v111_v29 = vmul.f32 %v109_v27, %v80_v25 }
  0xa6   :  { %112 = vst [vmem:[#allocation5] sm:$0xff] %v110_v28 }
  0xa7   :  { %113 = vst [vmem:[#allocation5 + $0x8] sm:$0xff] %v111_v29 }
  0xa8   :  { %126 = dma.vmem_to_hbm [thread:$0]  %s119_s5, 256, %s121_s0, [#allocation4], %s210_s20, %s210_s20, %s211_s21  }
  0xa9   :  { %207 = dma.done.wait [#allocation4], 256  }
  0xaa   :  { %208 = vsyncadd [#allocation4], 4294967040 }
  0xab   :  { %131 = vsyncpa [#allocation3], 1 }
  0xac   :  { %132 = vsyncpa [#allocation4], 1 }

</bundles_post_ra>
